<compile_context>
chip_gen: v6e
topology: v6e:2x2x1
jax: 0.10.0
libtpu: 0.0.40
codegen_flags: <defaults>
</compile_context>

<pallas_src>
import functools

import jax
import jax.numpy as jnp
from jax.experimental import pallas as pl
from jax.experimental.pallas import tpu as pltpu


# ---------------------------------------------------------------------------
# Kernels
# ---------------------------------------------------------------------------

def _pow_clamped(x_ref, p_ref, eps, int_p):
    """clamp(x, eps) ** p in f32. Integer-p fast path stays on the VPU."""
    x = jnp.maximum(x_ref[...].astype(jnp.float32), eps)
    if int_p is not None:
        return x ** int_p                      # lax.integer_pow -> VPU muls
    p = p_ref[0]
    return jnp.exp(p * jnp.log(x))             # general learned exponent (EUP)


def _root(m, p_ref, int_p):
    """m ** (1/p); runs once per row tile, so EUP cost here is negligible."""
    inv_p = (1.0 / int_p) if int_p is not None else (1.0 / p_ref[0])
    return jnp.exp(jnp.log(m) * inv_p)


def _gem_kernel_single(p_ref, x_ref, o_ref, *, eps, hw, int_p):
    # Whole H*W row fits in one tile: no accumulator, no pl.when regions.
    xp = _pow_clamped(x_ref, p_ref, eps, int_p)
    m = jnp.sum(xp, axis=-1, keepdims=True) * (1.0 / hw)
    o_ref[...] = _root(m, p_ref, int_p).astype(o_ref.dtype)


def _gem_kernel_multi(p_ref, x_ref, o_ref, acc_ref, *, eps, hw, tk, int_p):
    # p_ref:   (1,) learned exponent in SMEM
    # x_ref:   (TM, TK) input tile in VMEM (TK is a multiple of 128 here)
    # o_ref:   (TM, 1) output tile, written on the last K step only
    # acc_ref: (TM, 128) f32 lane-resident running sums (VPU-only updates)
    k = pl.program_id(1)
    nk = pl.num_programs(1)

    @pl.when(k == 0)
    def _():
        acc_ref[...] = jnp.zeros_like(acc_ref)

    xp = _pow_clamped(x_ref, p_ref, eps, int_p)

    def lane_partial(v):
        # Sum the TK/128 lane-aligned column chunks with VPU adds only; the
        # single cross-lane (XLU) reduce is deferred to the epilogue.
        part = v[:, 0:128]
        for c in range(1, tk // 128):
            part = part + v[:, c * 128:(c + 1) * 128]
        return part

    if hw % tk != 0:
        # Only the final spatial tile has padded columns -> gate the mask.
        @pl.when(k != nk - 1)
        def _():
            acc_ref[...] += lane_partial(xp)

        @pl.when(k == nk - 1)
        def _():
            col = jax.lax.broadcasted_iota(jnp.int32, xp.shape, 1) + k * tk
            acc_ref[...] += lane_partial(jnp.where(col < hw, xp, 0.0))
    else:
        acc_ref[...] += lane_partial(xp)

    @pl.when(k == nk - 1)
    def _():
        # NOTE: when nc % tm != 0 the padded rows of the last row tile compute
        # on undefined block padding; this is row-local and those rows are
        # never materialized into the (nc, 1) output, so it is benign. Keep
        # this reduction strictly per-row.
        m = jnp.sum(acc_ref[...], axis=-1, keepdims=True) * (1.0 / hw)
        o_ref[...] = _root(m, p_ref, int_p).astype(o_ref.dtype)


# ---------------------------------------------------------------------------
# Tiling heuristics
# ---------------------------------------------------------------------------

def _round_up(v, m):
    return -(-v // m) * m


def _choose_tiles(nc, hw, in_itemsize, out_itemsize):
    """Pick (TM, TK) so all VMEM blocks fit under the v5e 16 MiB default."""
    # Sublane multiple per dtype packing: 8 for f32, 16 for bf16, 32 for int8.
    sublane = max(8, 32 // max(in_itemsize, 1))

    TK_MAX = 2048                              # multiple of 128
    tk = hw if hw <= TK_MAX else TK_MAX
    nk = -(-hw // tk)
    lanes = _round_up(tk, 128)                 # hw < 128 still costs 128 lanes

    # Per-row VMEM: double-buffered input tile + double-buffered lane-padded
    # output block + (multi-tile only) the lane-resident f32 accumulator.
    per_row = 2 * lanes * in_itemsize + 2 * 128 * out_itemsize
    if nk > 1:
        per_row += 128 * 4
    budget = 12 * 1024 * 1024                  # < 16 MiB v5e default scoped VMEM
    tm = max(sublane, budget // per_row)
    tm = min(tm, 4096)
    tm = (tm // sublane) * sublane
    if tm >= nc:
        tm = nc                                # full dimension is a legal block

    # v7x: keep >= 2 row tiles so the "parallel" row axis feeds both
    # TensorCores (harmless on single-TC v5e/v6e).
    if nc >= 2 * sublane and -(-nc // tm) == 1:
        tm = _round_up(-(-nc // 2), sublane)

    return tm, tk


# ---------------------------------------------------------------------------
# Wrapper
# ---------------------------------------------------------------------------

def _static_int_p(p):
    """Return p as a Python int if it is concrete and integral, else None."""
    try:
        v = float(jax.device_get(p).reshape(-1)[0])
    except Exception:
        return None                            # traced / abstract: general path
    if v == round(v) and 1 <= round(v) <= 16:
        return int(round(v))
    return None


def gem_pallas(x, p, eps=1e-6):
    """x: (N, C, H, W) float array, p: (1,) float param. Returns (N, C, 1, 1)."""
    N, C, H, W = x.shape
    nc, hw = N * C, H * W
    x2 = x.reshape(nc, hw)
    p = jnp.asarray(p, dtype=jnp.float32).reshape(1)
    int_p = _static_int_p(p)

    tm, tk = _choose_tiles(nc, hw, x2.dtype.itemsize, x2.dtype.itemsize)
    grid_m = pl.cdiv(nc, tm)
    nk = pl.cdiv(hw, tk)

    if int_p is not None:
        flops = (2 + int_p) * nc * hw
        transcendentals = 4 * nc
    else:
        flops = 3 * nc * hw
        transcendentals = 2 * nc * hw
    cost = pl.CostEstimate(
        flops=flops, transcendentals=transcendentals,
        bytes_accessed=nc * hw * x2.dtype.itemsize + nc * x2.dtype.itemsize)

    p_spec = pl.BlockSpec(memory_space=pltpu.MemorySpace.SMEM)

    if nk == 1:
        kernel = functools.partial(_gem_kernel_single, eps=eps, hw=hw,
                                   int_p=int_p)
        out = pl.pallas_call(
            kernel,
            out_shape=jax.ShapeDtypeStruct((nc, 1), x.dtype),
            grid=(grid_m,),
            in_specs=[
                p_spec,
                pl.BlockSpec((tm, tk), lambda i: (i, 0)),
            ],
            out_specs=pl.BlockSpec((tm, 1), lambda i: (i, 0)),
            compiler_params=pltpu.CompilerParams(
                dimension_semantics=("parallel",)),
            cost_estimate=cost,
        )(p, x2)
    else:
        kernel = functools.partial(_gem_kernel_multi, eps=eps, hw=hw, tk=tk,
                                   int_p=int_p)
        out = pl.pallas_call(
            kernel,
            out_shape=jax.ShapeDtypeStruct((nc, 1), x.dtype),
            grid=(grid_m, nk),
            in_specs=[
                p_spec,
                pl.BlockSpec((tm, tk), lambda i, k: (i, k)),
            ],
            out_specs=pl.BlockSpec((tm, 1), lambda i, k: (i, 0)),
            scratch_shapes=[pltpu.VMEM((tm, 128), jnp.float32)],
            compiler_params=pltpu.CompilerParams(
                dimension_semantics=("parallel", "arbitrary")),
            cost_estimate=cost,
        )(p, x2)

    return out.reshape(N, C, 1, 1)


def gem_reference(x, p, eps=1e-6):
    xc = jnp.maximum(x.astype(jnp.float32), eps)
    m = jnp.mean(xc ** p, axis=(-2, -1), keepdims=True)
    return m ** (1.0 / p)


# ---------------------------------------------------------------------------
# Self-test
# ---------------------------------------------------------------------------

if __name__ == "__main__":
    key = jax.random.PRNGKey(0)
    eps = 1e-6
    # Deterministic parameter init per GeM.__init__: p = ones(1) * 3
    p_default = jnp.ones((1,), dtype=jnp.float32) * 3.0
    p_frac = jnp.ones((1,), dtype=jnp.float32) * 2.5   # exercises the EUP path

    tests = [
        # (shape, p, dtype, rtol, atol)
        ((2, 4, 16, 16), p_default, jnp.float32, 2e-4, 1e-5),  # primary shape
        ((2, 16, 7, 7), p_default, jnp.float32, 2e-4, 1e-5),   # hw < 128
        ((1, 8, 48, 48), p_default, jnp.float32, 2e-4, 1e-5),  # hw > TK (multi)
        ((1, 8, 48, 48), p_frac, jnp.float32, 2e-4, 1e-5),     # non-integer p
        ((2, 16, 7, 7), p_default, jnp.bfloat16, 1e-2, 1e-2),  # bf16 ingest
    ]
    for idx, (shape, p_param, dtype, rtol, atol) in enumerate(tests):
        N, C, H, W = shape
        k = jax.random.fold_in(key, idx)
        x = jax.random.normal(k, shape, dtype=jnp.float32).astype(dtype)
        out = jax.block_until_ready(gem_pallas(x, p_param, eps=eps))
        ref = gem_reference(x, p_param[0], eps=eps).astype(dtype)
        assert out.shape == (N, C, 1, 1), out.shape
        err = jnp.max(jnp.abs(out.astype(jnp.float32) - ref.astype(jnp.float32)))
        assert jnp.allclose(out.astype(jnp.float32), ref.astype(jnp.float32),
                            rtol=rtol, atol=atol), (
            f"shape {shape} dtype {dtype}: max err {err}")

    print("KERNEL_OK")
</pallas_src>

<mosaic_0001>
module attributes {stable_mosaic.version = 11 : i64} {
  func.func @_gem_kernel_single(%arg0: i32, %arg1: memref<1xf32, #tpu.memory_space<smem>>, %arg2: memref<8x256xf32, #tpu.memory_space<vmem>>, %arg3: memref<8x1xf32, #tpu.memory_space<vmem>>) attributes {dimension_semantics = [#tpu.dimension_semantics<parallel>], iteration_bounds = array<i64: 1>, scalar_prefetch = 0 : i64, scratch_operands = 0 : i64, tpu.core_type = #tpu.core_type<tc>, window_params = [{transform_indices = @transform_0, window_bounds = array<i64: 1>}, {transform_indices = @transform_1, window_bounds = array<i64: 8, 256>}, {transform_indices = @transform_2, window_bounds = array<i64: 8, 1>}]} {
    %c0 = arith.constant 0 : index
    %c0_0 = arith.constant 0 : index
    %0 = vector.load %arg2[%c0, %c0_0] : memref<8x256xf32, #tpu.memory_space<vmem>>, vector<8x256xf32>
    %cst = arith.constant 9.99999997E-7 : f32
    %1 = vector.broadcast %cst : f32 to vector<8x256xf32>
    %2 = arith.maximumf %0, %1 : vector<8x256xf32>
    %3 = arith.mulf %2, %2 : vector<8x256xf32>
    %4 = arith.mulf %2, %3 : vector<8x256xf32>
    %cst_1 = arith.constant dense<0.000000e+00> : vector<8xf32>
    %5 = vector.multi_reduction <add>, %4, %cst_1 [1] : vector<8x256xf32> to vector<8xf32>
    %6 = vector.shape_cast %5 : vector<8xf32> to vector<8x1xf32>
    %cst_2 = arith.constant 3.906250e-03 : f32
    %7 = vector.broadcast %cst_2 : f32 to vector<8x1xf32>
    %8 = arith.mulf %6, %7 : vector<8x1xf32>
    %9 = math.log %8 : vector<8x1xf32>
    %cst_3 = arith.constant 0.333333343 : f32
    %10 = vector.broadcast %cst_3 : f32 to vector<8x1xf32>
    %11 = arith.mulf %9, %10 : vector<8x1xf32>
    %12 = math.exp %11 : vector<8x1xf32>
    %c0_4 = arith.constant 0 : index
    %c0_5 = arith.constant 0 : index
    %13 = vector.load %arg3[%c0_4, %c0_5] : memref<8x1xf32, #tpu.memory_space<vmem>>, vector<8x1xf32>
    tpu.vector_store %arg3[%c0_4, %c0_5], %12 {strides = array<i32>} : memref<8x1xf32, #tpu.memory_space<vmem>>, vector<8x1xf32>,
    return
  }
  func.func @transform_0(%arg0: i32) -> i32 {
    %c0_i32 = arith.constant 0 : i32
    %c0_i32_0 = arith.constant 0 : i32
    return %c0_i32 : i32
  }
  func.func @transform_1(%arg0: i32) -> (i32, i32) {
    %c0_i32 = arith.constant 0 : i32
    %c0_i32_0 = arith.constant 0 : i32
    return %arg0, %c0_i32 : i32, i32
  }
  func.func @transform_2(%arg0: i32) -> (i32, i32) {
    %c0_i32 = arith.constant 0 : i32
    %c0_i32_0 = arith.constant 0 : i32
    return %arg0, %c0_i32 : i32, i32
  }
}

</mosaic_0001>

<bundles_post_ra>
// kernel: tpu_custom_call.1
= control target key start
LH: loop header
LB: loop body
LE: loop exit
PB: predicated region body
PF: predicated region fallthrough
CT: control target
= control target key end

     0   :  { %8 = vsyncpa [#allocation4], 0  ;;  %s75_s9 = smov [#allocation3]   ;;  %s97_s0 = inlined_call_operand.<no memory space> [shape: f32[1], index: 0, kind: input, shape index: {}]   ;;  %s98_s1 = inlined_call_operand.hbm [shape: f32[8,256], index: 1, kind: input, shape index: {}]   ;;  %s99_s2 = inlined_call_operand.vmem [shape: f32[8,1], index: 2, kind: output, shape index: {}]  }
   0x1   :  { %s17_s10 = sshll.u32 %s75_s9, 4  ;;  %s18_s10 = int_to_ptr.vmem [resolvable:$true] %s17_s10 }
   0x2   :  { %s61_s11 = scalar_lea.vmem %s18_s10, 256  ;;  %p66_p1 = scmp.lt.s32.totalorder %s18_s10, %s18_s10 }
   0x3   :  { %p62_p0 = scmp.ne.s32.totalorder %s18_s10, %s61_s11  ;;  %p67_p2 = scmp.lt.s32.totalorder %s61_s11, %s61_s11 }
   0x5   :  { %p68_p3 = por %p67_p2, %p66_p1 }
   0x7   :  { %p69_p4 = pnand %p68_p3, %p62_p0 }
   0x9   :  { %72 = shalt.err (!%p69_p4)
}
   0xa   :  { %20 = dma.hbm_to_vmem [thread:$0]  %s98_s1, 256, %s18_s10, [#allocation4]  }
   0xb   :  { %73 = dma.done.wait [#allocation4], 256  }
   0xc   :  { %74 = vsyncadd [#allocation4], 4294967040  ;;  %v24_v0 = vld [vmem:[#allocation3] sm:$0xff]  ;;  %v25_v1 = vld [vmem:[#allocation3 + $0x8] sm:$0xff]  ;;  %vm41_vm0 = vcmask 7168  }
   0xd   :  { %v26_v2 = vmax.f32 %v24_v0, 1e-06  ;;  %v27_v3 = vmax.f32 %v25_v1, 1e-06 }
   0xf   :  { %v28_v4 = vmul.f32 %v26_v2, %v26_v2  ;;  %v29_v5 = vmul.f32 %v27_v3, %v27_v3 }
  0x11   :  { %v30_v6 = vmul.f32 %v28_v4, %v26_v2  ;;  %v31_v7 = vmul.f32 %v29_v5, %v27_v3 }
  0x13   :  { %v32_v8 = vadd.f32 %v31_v7, %v30_v6 }
  0x15   :  { %33 = vadd.xlane.f32.xlu0 %v32_v8 }
  0x9e   :  { %v34_v9 = vpop.xlane.xlu0 %33 }
  0x9f   :  { %v35_v10 = vmul.f32 0.00390625, %v34_v9 }
  0xa1   :  { %49 = vlog2.f32 %v35_v10 }
  0xae   :  { %v50_v11 = vpop.eup %49 }
  0xaf   :  { %v37_v12 = vmul.f32 0.6931472, %v50_v11 }
  0xb1   :  { %v38_v13 = vmul.f32 0.33333334, %v37_v12 }
  0xb3   :  { %v39_v14 = vmul.f32 1.442695, %v38_v13 }
  0xb5   :  { %51 = vpow2.f32 %v39_v14 }
  0xc2   :  { %v52_v15 = vpop.eup %51 }
  0xc3   :  { %42 = vst.msk [vmem:[%s99_s2] sm:$0xff] %vm41_vm0, %v52_v15 }
  0xc4   :  { %47 = vsyncpa [#allocation4], 1 }

</bundles_post_ra>
